<compile_context>
chip_gen: v7x
topology: tpu7x:2x2x1
jax: 0.10.0
libtpu: 0.0.40
codegen_flags: <defaults>
</compile_context>

<pallas_src>
import functools
import numpy as np
import jax
import jax.numpy as jnp
from jax import lax
from jax.experimental import pallas as pl
from jax.experimental.pallas import tpu as pltpu


# ----------------------------- small helpers --------------------------------------
def _round_up(x, m):
    return ((x + m - 1) // m) * m


def _pick_row_tile(n):
    # Largest row tile whose [tile, n] f32 block (double buffered) stays well under
    # the scoped-VMEM budget on every TPU generation (v7x: 64 MiB physical / TC).
    budget = 8 * 1024 * 1024
    cap = max(8, budget // max(1, 4 * n))
    if n <= cap:
        return n
    for t in (1024, 512, 256, 128):
        if t <= cap and n % t == 0:
            return t
    # TODO(synk): pad ragged N (not a multiple of 128) instead of one big block.
    return n


def _vmem_limit(nbytes):
    # Explicit scoped-VMEM budget with headroom, capped for v7x's 64 MiB VMEM.
    return int(min(64 * 1024 * 1024, max(8 * 1024 * 1024, 2 * nbytes + (1 << 20))))


# ----------------------------- kernel 1a: row sums of A ---------------------------
def _rowsum_kernel(adj_ref, out_ref):
    # s1 = row_sum(A) for this row tile, written lane-dense as [1, tile].
    out_ref[...] = jnp.sum(adj_ref[...], axis=1)[None, :]


# ----------------------------- kernel 1b: diffusion-centrality scores -------------
def _score_kernel(adj_ref, s1_full_ref, s1_tile_ref, q_ref, out_ref):
    # diffusion centrality for t=2:  row_sum(q*A + q^2*A@A)
    #                              = q*s1 + q^2*(A @ s1)    with s1 = row_sum(A).
    a = adj_ref[...]                        # [tile, N]
    s1 = s1_full_ref[...]                   # [1, N]
    q = q_ref[0, 0]
    s2 = jnp.sum(a * s1, axis=1)[None, :]   # (A @ s1) for this row tile -> [1, tile]
    out_ref[...] = q * s1_tile_ref[...] + (q * q) * s2


def diffusion_scores(adj, q):
    n = adj.shape[0]
    adj = adj.astype(jnp.float32)
    tm = _pick_row_tile(n)
    grid = (n // tm,)
    q_arr = jnp.full((1, 1), q, dtype=jnp.float32)

    s1 = pl.pallas_call(
        _rowsum_kernel,
        out_shape=jax.ShapeDtypeStruct((1, n), jnp.float32),
        grid=grid,
        in_specs=[pl.BlockSpec((tm, n), lambda i: (i, 0))],
        out_specs=pl.BlockSpec((1, tm), lambda i: (0, i)),
        compiler_params=pltpu.CompilerParams(
            dimension_semantics=("parallel",),
            vmem_limit_bytes=_vmem_limit(4 * (tm * n + tm))),
    )(adj)

    scores = pl.pallas_call(
        _score_kernel,
        out_shape=jax.ShapeDtypeStruct((1, n), jnp.float32),
        grid=grid,
        in_specs=[
            pl.BlockSpec((tm, n), lambda i: (i, 0)),              # A row tile
            pl.BlockSpec((1, n), lambda i: (0, 0)),               # s1 (full, mat-vec)
            pl.BlockSpec((1, tm), lambda i: (0, i)),              # s1 (this tile's rows)
            pl.BlockSpec(memory_space=pltpu.MemorySpace.SMEM),    # q scalar
        ],
        out_specs=pl.BlockSpec((1, tm), lambda i: (0, i)),
        compiler_params=pltpu.CompilerParams(
            dimension_semantics=("parallel",),
            vmem_limit_bytes=_vmem_limit(4 * (tm * n + n + 2 * tm))),
    )(adj, s1, s1, q_arr)
    return scores[0]


# ----------------------------- kernel 2: LSTM over ordered nodes ------------------
def _lstm_kernel(order_ref, x_ref, wih_ref, whh_ref, b_ref, hn_ref, xp_ref,
                 *, hp, seq_len, unroll):
    # Input projections for every node in one MXU pass:
    #   xp[n] = x[n] @ W_ih^T + (b_ih + b_hh)   (gate-padded layout, [N, 4*Hp]).
    # The centrality order is applied at read time below, so node_embeds never has
    # to be gathered / re-materialised in HBM.
    xp_ref[...] = (
        jnp.dot(x_ref[...], wih_ref[...], preferred_element_type=jnp.float32)
        + b_ref[...])

    def one_step(t, h, c):
        row = order_ref[t]                                        # SMEM scalar read
        gates = xp_ref[pl.ds(row, 1), :] + jnp.dot(
            h, whh_ref[...], preferred_element_type=jnp.float32)  # [1, 4*Hp]
        # Gate blocks are 128-lane aligned (hp % 128 == 0): free vreg slices.
        i = jax.nn.sigmoid(gates[:, 0 * hp:1 * hp])
        f = jax.nn.sigmoid(gates[:, 1 * hp:2 * hp])
        g = jnp.tanh(gates[:, 2 * hp:3 * hp])
        o = jax.nn.sigmoid(gates[:, 3 * hp:4 * hp])
        c_new = f * c + i * g
        h_new = o * jnp.tanh(c_new)
        return h_new, c_new

    # h/c live in vregs as fori_loop carries (no per-step VMEM round trips).
    h = jnp.zeros((1, hp), jnp.float32)
    c = jnp.zeros((1, hp), jnp.float32)

    n_blocks = seq_len // unroll
    if n_blocks > 0:
        def main_body(blk, carry):
            h, c = carry
            base = blk * unroll
            for u in range(unroll):     # manual unroll: scheduler sees `unroll` steps
                h, c = one_step(base + u, h, c)
            return h, c
        h, c = lax.fori_loop(0, n_blocks, main_body, (h, c))

    if n_blocks * unroll < seq_len:     # static remainder (skipped when it divides)
        def tail_body(t, carry):
            return one_step(t, *carry)
        h, c = lax.fori_loop(n_blocks * unroll, seq_len, tail_body, (h, c))

    # TODO(synk): for large hidden, pin W_hh in the MXU weight registers across the
    # recurrence (pltpu.matmul_push_rhs / matmul_acc_lhs) instead of re-streaming it.
    hn_ref[...] = h


def lstm_last_hidden(node_embeds, order, w_ih, w_hh, b_ih, b_hh, hidden, *, unroll=4):
    n, in_dim = node_embeds.shape
    hp = _round_up(hidden, 128)       # lane-aligned per-gate block width

    def pad_gate_cols(w2d):           # [rows, 4*hidden] -> [rows, 4*hp], zero padded
        rows = w2d.shape[0]
        w4 = w2d.reshape(rows, 4, hidden)
        w4 = jnp.pad(w4, ((0, 0), (0, 0), (0, hp - hidden)))
        return w4.reshape(rows, 4 * hp)

    x = node_embeds.astype(jnp.float32)
    w_ih_t = pad_gate_cols(jnp.transpose(w_ih).astype(jnp.float32))       # [in_dim, 4Hp]
    w_hh_t = pad_gate_cols(jnp.transpose(w_hh).astype(jnp.float32))       # [H, 4Hp]
    w_hh_t = jnp.pad(w_hh_t, ((0, hp - hidden), (0, 0)))                  # [Hp, 4Hp]
    b = pad_gate_cols((b_ih + b_hh).reshape(1, 4 * hidden).astype(jnp.float32))

    kernel = functools.partial(_lstm_kernel, hp=hp, seq_len=n, unroll=unroll)
    vmem_bytes = 4 * (n * in_dim + in_dim * 4 * hp + hp * 4 * hp + 4 * hp
                      + n * 4 * hp + hp)
    # TODO(synk): for very large N, stream xp in sequence chunks (emit_pipeline)
    # instead of materialising one [N, 4*Hp] scratch.
    out = pl.pallas_call(
        kernel,
        out_shape=jax.ShapeDtypeStruct((1, hp), jnp.float32),
        in_specs=[
            pl.BlockSpec(memory_space=pltpu.MemorySpace.SMEM),   # node order (int32)
            pl.BlockSpec(memory_space=pltpu.MemorySpace.VMEM),   # node_embeds
            pl.BlockSpec(memory_space=pltpu.MemorySpace.VMEM),   # w_ih_t (padded)
            pl.BlockSpec(memory_space=pltpu.MemorySpace.VMEM),   # w_hh_t (padded)
            pl.BlockSpec(memory_space=pltpu.MemorySpace.VMEM),   # bias (padded)
        ],
        out_specs=pl.BlockSpec(memory_space=pltpu.MemorySpace.VMEM),
        scratch_shapes=[pltpu.VMEM((n, 4 * hp), jnp.float32)],   # input projections xp
        compiler_params=pltpu.CompilerParams(
            vmem_limit_bytes=_vmem_limit(vmem_bytes)),
    )(order.astype(jnp.int32), x, w_ih_t, w_hh_t, b)
    return out[:, :hidden]


# ----------------------------- full forward ---------------------------------------
def diff_cen_agg_forward(node_embeds, edge_fts, edges, params, hidden, t=2):
    del t  # the module's forward hard-codes t=2; kernels implement q*A + q^2*A@A.
    n = node_embeds.shape[0]
    adj = jnp.zeros((n, n), jnp.float32).at[edges[0], edges[1]].set(
        edge_fts[:, 0].astype(jnp.float32))
    # TODO(synk): general (non-symmetric) eig has no TPU lowering, and eigvals()[0]
    # (first returned, not the spectral radius) is what the PyTorch code uses, so it
    # stays on the host; an on-device power iteration would change semantics.
    lam = np.linalg.eigvals(np.asarray(jax.device_get(adj)))[0]
    q = 1.0 / float(np.real(lam))
    scores = diffusion_scores(adj, q)                 # Pallas kernels 1a/1b
    order = jnp.argsort(-scores).astype(jnp.int32)    # descending centrality
    hn = lstm_last_hidden(node_embeds, order, params["w_ih"], params["w_hh"],
                          params["b_ih"], params["b_hh"], hidden)  # Pallas kernel 2
    return hn


# ----------------------------- reference (plain JAX) for self-check ---------------
def _reference(node_embeds, edge_fts, edges, params, hidden):
    n = node_embeds.shape[0]
    adj = jnp.zeros((n, n), jnp.float32).at[edges[0], edges[1]].set(
        edge_fts[:, 0].astype(jnp.float32))
    lam = np.linalg.eigvals(np.asarray(adj))[0]
    q = 1.0 / float(np.real(lam))
    Hm = q * adj + (q * q) * (adj @ adj)
    order = jnp.argsort(-Hm.sum(axis=1))
    x = node_embeds[order]
    h = jnp.zeros((hidden,), jnp.float32)
    c = jnp.zeros((hidden,), jnp.float32)
    for step in range(n):
        gates = (params["w_ih"] @ x[step] + params["b_ih"]
                 + params["w_hh"] @ h + params["b_hh"])
        i, f, g, o = jnp.split(gates, 4)
        i, f, g, o = jax.nn.sigmoid(i), jax.nn.sigmoid(f), jnp.tanh(g), jax.nn.sigmoid(o)
        c = f * c + i * g
        h = o * jnp.tanh(c)
    return h[None, :]


if __name__ == "__main__":
    N, IN_DIM, HIDDEN = 8, 16, 32
    key = jax.random.PRNGKey(0)
    k1, k2, k3, k4, k5, k6 = jax.random.split(key, 6)

    # node features
    node_embeds = jax.random.normal(k1, (N, IN_DIM), jnp.float32)

    # symmetric weighted ring graph (real spectrum, unique edge indices)
    src = jnp.arange(N, dtype=jnp.int32)
    dst = (src + 1) % N
    edges = jnp.stack([jnp.concatenate([src, dst]),
                       jnp.concatenate([dst, src])])              # [2, 2N]
    w_half = jax.random.uniform(k2, (N,), jnp.float32, 0.5, 1.5)
    w = jnp.concatenate([w_half, w_half])
    other = jax.random.normal(k3, (2 * N, 1), jnp.float32)
    edge_fts = jnp.concatenate([w[:, None], other], axis=1)       # [E=2N, 2] (only col 0 used)

    # LSTM parameters, PyTorch-style U(-k, k), k = 1/sqrt(hidden)
    bound = 1.0 / np.sqrt(HIDDEN)
    params = {
        "w_ih": jax.random.uniform(k4, (4 * HIDDEN, IN_DIM), jnp.float32, -bound, bound),
        "w_hh": jax.random.uniform(k5, (4 * HIDDEN, HIDDEN), jnp.float32, -bound, bound),
        "b_ih": jax.random.uniform(k6, (4 * HIDDEN,), jnp.float32, -bound, bound),
        "b_hh": jax.random.uniform(jax.random.fold_in(key, 7), (4 * HIDDEN,),
                                   jnp.float32, -bound, bound),
    }

    hn = diff_cen_agg_forward(node_embeds, edge_fts, edges, params, HIDDEN)
    hn = jax.block_until_ready(hn)

    ref = _reference(node_embeds, edge_fts, edges, params, HIDDEN)
    assert hn.shape == (1, HIDDEN), hn.shape
    assert np.allclose(np.asarray(hn), np.asarray(ref), atol=1e-4), "kernel/reference mismatch"

    print("KERNEL_OK")
</pallas_src>

<mosaic_0001>
module attributes {stable_mosaic.version = 11 : i64} {
  func.func @_rowsum_kernel(%arg0: i32, %arg1: memref<8x8xf32, #tpu.memory_space<vmem>>, %arg2: memref<1x8xf32, #tpu.memory_space<vmem>>) attributes {dimension_semantics = [#tpu.dimension_semantics<parallel>], iteration_bounds = array<i64: 1>, scalar_prefetch = 0 : i64, scratch_operands = 0 : i64, tpu.core_type = #tpu.core_type<tc>, window_params = [{transform_indices = @transform_0, window_bounds = array<i64: 8, 8>}, {transform_indices = @transform_1, window_bounds = array<i64: 1, 8>}]} {
    %c0 = arith.constant 0 : index
    %c0_0 = arith.constant 0 : index
    %0 = vector.load %arg1[%c0, %c0_0] : memref<8x8xf32, #tpu.memory_space<vmem>>, vector<8x8xf32>
    %cst = arith.constant dense<0.000000e+00> : vector<8xf32>
    %1 = vector.multi_reduction <add>, %0, %cst [1] : vector<8x8xf32> to vector<8xf32>
    %2 = vector.shape_cast %1 : vector<8xf32> to vector<1x8xf32>
    %c0_1 = arith.constant 0 : index
    %c0_2 = arith.constant 0 : index
    %3 = vector.load %arg2[%c0_1, %c0_2] : memref<1x8xf32, #tpu.memory_space<vmem>>, vector<1x8xf32>
    tpu.vector_store %arg2[%c0_1, %c0_2], %2 {strides = array<i32>} : memref<1x8xf32, #tpu.memory_space<vmem>>, vector<1x8xf32>,
    return
  }
  func.func @transform_0(%arg0: i32) -> (i32, i32) {
    %c0_i32 = arith.constant 0 : i32
    %c0_i32_0 = arith.constant 0 : i32
    return %arg0, %c0_i32 : i32, i32
  }
  func.func @transform_1(%arg0: i32) -> (i32, i32) {
    %c0_i32 = arith.constant 0 : i32
    %c0_i32_0 = arith.constant 0 : i32
    return %c0_i32, %arg0 : i32, i32
  }
}

</mosaic_0001>

<bundles_post_ra>
// kernel: tpu_custom_call.1
= control target key start
LH: loop header
LB: loop body
LE: loop exit
PB: predicated region body
PF: predicated region fallthrough
CT: control target
= control target key end

     0   :  { %6 = vsyncpa [#allocation3], 0  ;;  %s137_s0 = inlined_call_operand.hbm [shape: f32[8,8], index: 0, kind: input, shape index: {}]   ;;  %s138_s1 = inlined_call_operand.hbm [shape: f32[1,8], index: 1, kind: output, shape index: {}]  }
   0x1   :  { %7 = vsyncpa [#allocation4], 0  ;;  %s101_s6 = smov [#allocation2]   ;;  %s53_s10 = scalar_lea.hbm %s137_s0, 128 }
   0x2   :  { %s14_s7 = sshll.u32 %s101_s6, 4  ;;  %p54_p0 = scmp.ne.s32.totalorder %s137_s0, %s53_s10  ;;  %s15_s7 = int_to_ptr.vmem [resolvable:$true] %s14_s7 }
   0x3   :  { %p57_p1 = scmp.lt.u32.totalorder %s53_s10, %s137_s0 }
   0x5   :  { %p59_p2 = pnand %p57_p1, %p54_p0 }
   0x7   :  { %62 = shalt.err (!%p59_p2)
}
   0x8   :  { %s63_s15 = scalar_lea.vmem %s15_s7, 128  ;;  %p68_p4 = scmp.lt.s32.totalorder %s15_s7, %s15_s7 }
   0x9   :  { %p64_p3 = scmp.ne.s32.totalorder %s15_s7, %s63_s15  ;;  %p69_p5 = scmp.lt.s32.totalorder %s63_s15, %s63_s15 }
   0xb   :  { %p70_p6 = por %p69_p5, %p68_p4 }
   0xd   :  { %p71_p7 = pnand %p70_p6, %p64_p3 }
   0xf   :  { %74 = shalt.err (!%p71_p7)
}
  0x10   :  { %17 = dma.hbm_to_vmem [thread:$0]  %s137_s0, 128, %s15_s7, [#allocation3]  }
  0x11   :  { %97 = dma.done.wait [#allocation3], 128  }
  0x12   :  { %98 = vsyncadd [#allocation3], 4294967168  ;;  %vm22_vm0 = vcmask 64512   ;;  %v21_v0 = vld [vmem:[#allocation2] sm:$0xff]  ;;  %v27_v2 = vlaneseq  ;;  %s102_s18 = smov [#allocation5]   ;;  %vm34_vm1 = vcmask 57344  }
  0x13   :  { %v23_v1 = vsel %vm22_vm0, %v21_v0, 0.0  ;;  %s42_s19 = sshll.u32 %s102_s18, 4  ;;  %s43_s19 = int_to_ptr.vmem [resolvable:$true] %s42_s19 }
  0x14   :  { %24 = vadd.xlane.f32.xlu0 %v23_v1  ;;  %v28_v3 = vand.u32 127, %v27_v2  ;;  %v30_v4 = vshrl.u32 %v27_v2, 7  ;;  %s75_s20 = scalar_lea.vmem %s43_s19, 16  ;;  %s79_s0 = scalar_lea.vmem %s43_s19, 32 }
  0x15   :  { %p76_p8 = scmp.ne.s32.totalorder %s43_s19, %s75_s20  ;;  %p80_p9 = scmp.lt.s32.totalorder %s43_s19, %s43_s19 }
  0x16   :  { %v31_v5 = vsub.s32 %v28_v3, %v30_v4  ;;  %p81_p10 = scmp.lt.s32.totalorder %s79_s0, %s75_s20 }
  0x18   :  { %p82_p11 = por %p81_p10, %p80_p9 }
  0x1a   :  { %p83_p12 = pnand %p82_p11, %p76_p8 }
  0xa1   :  { %v25_v6 = vpop.xlane.xlu0 %24 }
  0xa2   :  { %v32_v7 = vrot.slane %v25_v6, %v31_v5 }
  0xa4   :  { %35 = vst.msk [vmem:[#allocation5] sm:$0x1] %vm34_vm1, %v32_v7 }
  0xa5   :  { %86 = shalt.err (!%p83_p12)
}
  0xa6   :  { %s87_s23 = scalar_lea.hbm %s138_s1, 16 }
  0xa7   :  { %p88_p13 = scmp.ne.s32.totalorder %s138_s1, %s87_s23  ;;  %p91_p0 = scmp.lt.u32.totalorder %s87_s23, %s138_s1 }
  0xa9   :  { %p93_p1 = pnand %p91_p0, %p88_p13 }
  0xab   :  { %96 = shalt.err (!%p93_p1)
}
  0xac   :  { %45 = dma.vmem_to_hbm [thread:$0]  %s43_s19, 16, %s138_s1, [#allocation4]  }
  0xad   :  { %99 = dma.done.wait [#allocation4], 16  }
  0xae   :  { %100 = vsyncadd [#allocation4], 4294967280 }
  0xaf   :  { %49 = vsyncpa [#allocation3], 1 }
  0xb0   :  { %50 = vsyncpa [#allocation4], 1 }

</bundles_post_ra>
